<compile_context>
chip_gen: v5e
topology: v5e:2x2
jax: 0.10.0
libtpu: 0.0.40
codegen_flags: <defaults>
</compile_context>

<pallas_src>
import functools

import jax
import jax.numpy as jnp
from jax.experimental import pallas as pl
from jax.experimental.pallas import tpu as pltpu

_NEG_FILL = -1e30  # padded-class filler: exp(_NEG_FILL - row_max) underflows to exactly 0


def _round_up(x, m):
    return ((x + m - 1) // m) * m


def _choose_tile_n(n, c_pad, itemsize, tile_budget_bytes, max_tile=1024):
    """Pick a batch tile: single full block if it fits, else a multiple of 128 rows."""
    n8 = _round_up(max(n, 1), 8)
    rows_fit = max(8, tile_budget_bytes // (c_pad * itemsize))
    if n8 <= min(rows_fit, max_tile):
        return n8                                   # grid == 1, block equals padded N
    tile = min(max_tile, rows_fit)
    return max(128, (tile // 128) * 128)            # keep lane-dense cw blocks legal


def weighted_ce_kernel(logits_ref, target_ref, cw_ref, out_ref, acc_ref, *, n_true):
    # logits_ref: (TILE_N, C_pad) native dtype  — upcast per tile
    # target_ref: (TILE_N, 1) int32 class indices (padded rows hold 0, masked out)
    # cw_ref:     (1, TILE_N) f32 complexity weights (zero-padded rows)
    # out_ref:    (1, 1) f32 in SMEM
    # acc_ref:    (2,) f32 in SMEM — [sum_nll, sum_cw] running across grid steps
    i = pl.program_id(0)
    num_blocks = pl.num_programs(0)

    @pl.when(i == 0)
    def _init():
        acc_ref[0] = 0.0
        acc_ref[1] = 0.0

    logits = logits_ref[...].astype(jnp.float32)            # (TILE_N, C_pad)
    tn, cp = logits.shape
    tgt = target_ref[...]                                    # (TILE_N, 1) int32
    cw = cw_ref[...].astype(jnp.float32)                     # (1, TILE_N)

    # Mask rows beyond the true batch size (ragged last tile / sublane padding).
    row_ids = i * tn + jax.lax.broadcasted_iota(jnp.int32, (tn, 1), 0)
    valid = row_ids < n_true                                 # (TILE_N, 1) bool

    # Numerically stable log-softmax pieces (padded columns vanish: exp underflows to 0).
    row_max = jnp.max(logits, axis=-1, keepdims=True)        # (TILE_N, 1)
    shifted = logits - row_max                                # (TILE_N, C_pad)
    lse = jnp.log(jnp.sum(jnp.exp(shifted), axis=-1, keepdims=True))  # (TILE_N, 1)

    # Target-logit "gather" via select (no one-hot multiply / int->f32 convert).
    col_ids = jax.lax.broadcasted_iota(jnp.int32, (tn, cp), 1)
    tgt_shifted = jnp.sum(jnp.where(col_ids == tgt, shifted, 0.0),
                          axis=-1, keepdims=True)             # (TILE_N, 1)

    nll = jnp.where(valid, lse - tgt_shifted, 0.0)            # (TILE_N, 1)

    acc_ref[0] += jnp.sum(nll)
    acc_ref[1] += jnp.sum(cw)                                 # cw already zero-padded

    @pl.when(i == num_blocks - 1)
    def _finalize():
        inv_n = 1.0 / n_true                                  # global N, not tile size
        out_ref[0, 0] = (acc_ref[0] * inv_n) * (acc_ref[1] * inv_n)


def weighted_loss(logits, target, complexity_weights, *,
                  tile_budget_bytes=4 * 1024 * 1024):
    """logits: (N, C) any float dtype; target: (N,) int; complexity_weights: (N,) float."""
    n, c = logits.shape
    itemsize = jnp.dtype(logits.dtype).itemsize
    c_pad = _round_up(c, 128)
    tile_n = _choose_tile_n(n, c_pad, itemsize, tile_budget_bytes)
    n_pad = _round_up(n, tile_n)
    grid = n_pad // tile_n

    # Lane-dense class dim: pad with a large negative (exact — see kernel comment).
    if c_pad != c:
        logits = jnp.pad(logits, ((0, 0), (0, c_pad - c)), constant_values=_NEG_FILL)
    if n_pad != n:
        logits = jnp.pad(logits, ((0, n_pad - n), (0, 0)))    # padded rows masked in-kernel
    target_2d = jnp.pad(target.astype(jnp.int32), (0, n_pad - n)).reshape(n_pad, 1)
    cw_row = jnp.pad(complexity_weights.astype(jnp.float32),
                     (0, n_pad - n)).reshape(1, n_pad)        # lane-dense row layout

    tile_bytes = tile_n * c_pad * itemsize
    vmem_limit = int(min(64 * 1024 * 1024,
                         max(8 * 1024 * 1024, 4 * tile_bytes + (2 << 20))))

    kernel = functools.partial(weighted_ce_kernel, n_true=n)

    out = pl.pallas_call(
        kernel,
        out_shape=jax.ShapeDtypeStruct((1, 1), jnp.float32),
        grid_spec=pltpu.PrefetchScalarGridSpec(
            num_scalar_prefetch=0,
            grid=(grid,),
            in_specs=[
                pl.BlockSpec((tile_n, c_pad), lambda i: (i, 0)),   # logits tile (native dtype)
                pl.BlockSpec((tile_n, 1), lambda i: (i, 0)),       # target column
                pl.BlockSpec((1, tile_n), lambda i: (0, i)),       # lane-dense weights
            ],
            out_specs=pl.BlockSpec((1, 1), lambda i: (0, 0),
                                   memory_space=pltpu.MemorySpace.SMEM),
            scratch_shapes=[pltpu.SMEM((2,), jnp.float32)],
        ),
        compiler_params=pltpu.CompilerParams(
            dimension_semantics=("arbitrary",),   # batch axis carries the accumulator
            vmem_limit_bytes=vmem_limit,
        ),
    )(logits, target_2d, cw_row)
    return out[0, 0]


def _reference(logits, target, cw):
    logp = jax.nn.log_softmax(logits.astype(jnp.float32), axis=-1)
    ce = -jnp.mean(logp[jnp.arange(logits.shape[0]), target])
    return jnp.mean(ce * cw.astype(jnp.float32))


if __name__ == "__main__":
    key = jax.random.PRNGKey(0)

    # Small deterministic case: N=8, C=32 (single block, padded class dim).
    k1, k2, k3 = jax.random.split(key, 3)
    N, C = 8, 32
    logits = jax.random.normal(k1, (N, C), dtype=jnp.float32)
    target = jax.random.randint(k2, (N,), 0, C, dtype=jnp.int32)
    cw = jax.random.uniform(k3, (N,), dtype=jnp.float32) + 0.5

    result = jax.block_until_ready(weighted_loss(logits, target, cw))
    ref = _reference(logits, target, cw)
    assert jnp.allclose(result, ref, rtol=1e-5, atol=1e-5), (result, ref)

    # Ragged, multi-block case exercising the grid pipeline + masking:
    # N=300, C=200 -> C_pad=256, TILE_N=128, grid=3 (tiny tile budget forces tiling).
    k4, k5, k6 = jax.random.split(jax.random.PRNGKey(1), 3)
    N2, C2 = 300, 200
    logits2 = jax.random.normal(k4, (N2, C2), dtype=jnp.float32)
    target2 = jax.random.randint(k5, (N2,), 0, C2, dtype=jnp.int32)
    cw2 = jax.random.uniform(k6, (N2,), dtype=jnp.float32) + 0.5

    result2 = jax.block_until_ready(
        weighted_loss(logits2, target2, cw2, tile_budget_bytes=128 * 1024))
    ref2 = _reference(logits2, target2, cw2)
    assert jnp.allclose(result2, ref2, rtol=1e-4, atol=1e-5), (result2, ref2)

    print("KERNEL_OK")
</pallas_src>

<mosaic_0001>
module attributes {stable_mosaic.version = 11 : i64} {
  func.func @weighted_ce_kernel(%arg0: i32, %arg1: memref<8x128xf32, #tpu.memory_space<vmem>>, %arg2: memref<8x1xi32, #tpu.memory_space<vmem>>, %arg3: memref<1x8xf32, #tpu.memory_space<vmem>>, %arg4: memref<1x1xf32, #tpu.memory_space<smem>>, %arg5: memref<2xf32, #tpu.memory_space<smem>>) attributes {dimension_semantics = [#tpu.dimension_semantics<arbitrary>], iteration_bounds = array<i64: 1>, scalar_prefetch = 0 : i64, scratch_operands = 1 : i64, tpu.core_type = #tpu.core_type<tc>, window_params = [{transform_indices = @transform_0, window_bounds = array<i64: 8, 128>}, {transform_indices = @transform_1, window_bounds = array<i64: 8, 1>}, {transform_indices = @transform_2, window_bounds = array<i64: 1, 8>}, {transform_indices = @transform_3, window_bounds = array<i64: 1, 1>}]} {
    %c0_i32 = arith.constant 0 : i32
    %0 = arith.cmpi eq, %arg0, %c0_i32 : i32
    %1 = arith.extui %0 : i1 to i32
    %c0_i32_0 = arith.constant 0 : i32
    %2 = arith.cmpi ne, %1, %c0_i32_0 : i32
    scf.if %2 {
      %cst_18 = arith.constant 0.000000e+00 : f32
      %c0_19 = arith.constant 0 : index
      %47 = memref.load %arg5[%c0_19] : memref<2xf32, #tpu.memory_space<smem>>
      memref.store %cst_18, %arg5[%c0_19] : memref<2xf32, #tpu.memory_space<smem>>
      %cst_20 = arith.constant 0.000000e+00 : f32
      %c1_21 = arith.constant 1 : index
      %48 = memref.load %arg5[%c1_21] : memref<2xf32, #tpu.memory_space<smem>>
      memref.store %cst_20, %arg5[%c1_21] : memref<2xf32, #tpu.memory_space<smem>>
    } else {
    }
    %c0 = arith.constant 0 : index
    %c0_1 = arith.constant 0 : index
    %3 = vector.load %arg1[%c0, %c0_1] : memref<8x128xf32, #tpu.memory_space<vmem>>, vector<8x128xf32>
    %c0_2 = arith.constant 0 : index
    %c0_3 = arith.constant 0 : index
    %4 = vector.load %arg2[%c0_2, %c0_3] : memref<8x1xi32, #tpu.memory_space<vmem>>, vector<8x1xi32>
    %c0_4 = arith.constant 0 : index
    %c0_5 = arith.constant 0 : index
    %5 = vector.load %arg3[%c0_4, %c0_5] : memref<1x8xf32, #tpu.memory_space<vmem>>, vector<1x8xf32>
    %c8_i32 = arith.constant 8 : i32
    %6 = arith.muli %arg0, %c8_i32 : i32
    %7 = tpu.iota {dimensions = array<i32: 0>} : vector<8x1xi32>
    %8 = vector.broadcast %6 : i32 to vector<8x1xi32>
    %9 = arith.addi %8, %7 : vector<8x1xi32>
    %c8_i32_6 = arith.constant 8 : i32
    %10 = vector.broadcast %c8_i32_6 : i32 to vector<8x1xi32>
    %11 = arith.cmpi slt, %9, %10 : vector<8x1xi32>
    %cst = arith.constant dense<0xFF800000> : vector<8xf32>
    %12 = vector.multi_reduction <maximumf>, %3, %cst [1] : vector<8x128xf32> to vector<8xf32>
    %13 = vector.shape_cast %12 : vector<8xf32> to vector<8x1xf32>
    %14 = vector.broadcast %13 : vector<8x1xf32> to vector<8x128xf32>
    %15 = arith.subf %3, %14 : vector<8x128xf32>
    %16 = math.exp %15 : vector<8x128xf32>
    %cst_7 = arith.constant dense<0.000000e+00> : vector<8xf32>
    %17 = vector.multi_reduction <add>, %16, %cst_7 [1] : vector<8x128xf32> to vector<8xf32>
    %18 = vector.shape_cast %17 : vector<8xf32> to vector<8x1xf32>
    %19 = math.log %18 : vector<8x1xf32>
    %20 = tpu.iota {dimensions = array<i32: 1>} : vector<8x128xi32>
    %21 = vector.broadcast %4 : vector<8x1xi32> to vector<8x128xi32>
    %22 = arith.cmpi eq, %20, %21 : vector<8x128xi32>
    %cst_8 = arith.constant 0.000000e+00 : f32
    %23 = vector.broadcast %cst_8 : f32 to vector<8x128xf32>
    %24 = arith.select %22, %15, %23 : vector<8x128xi1>, vector<8x128xf32>
    %cst_9 = arith.constant dense<0.000000e+00> : vector<8xf32>
    %25 = vector.multi_reduction <add>, %24, %cst_9 [1] : vector<8x128xf32> to vector<8xf32>
    %26 = vector.shape_cast %25 : vector<8xf32> to vector<8x1xf32>
    %27 = arith.subf %19, %26 : vector<8x1xf32>
    %cst_10 = arith.constant 0.000000e+00 : f32
    %28 = vector.broadcast %cst_10 : f32 to vector<8x1xf32>
    %29 = arith.select %11, %27, %28 : vector<8x1xi1>, vector<8x1xf32>
    %c0_11 = arith.constant 0 : index
    %30 = memref.load %arg5[%c0_11] : memref<2xf32, #tpu.memory_space<smem>>
    %31 = vector.shape_cast %29 : vector<8x1xf32> to vector<1x8x1xf32>
    %cst_12 = arith.constant dense<0.000000e+00> : vector<1xf32>
    %32 = vector.multi_reduction <add>, %31, %cst_12 [1, 2] : vector<1x8x1xf32> to vector<1xf32>
    %33 = vector.shape_cast %32 : vector<1xf32> to vector<1x1x1xf32>
    %34 = vector.extract %33[0, 0, 0] : f32 from vector<1x1x1xf32>
    %35 = arith.addf %30, %34 : f32
    %c0_13 = arith.constant 0 : index
    %36 = memref.load %arg5[%c0_13] : memref<2xf32, #tpu.memory_space<smem>>
    memref.store %35, %arg5[%c0_13] : memref<2xf32, #tpu.memory_space<smem>>
    %c1 = arith.constant 1 : index
    %37 = memref.load %arg5[%c1] : memref<2xf32, #tpu.memory_space<smem>>
    %38 = vector.shape_cast %5 : vector<1x8xf32> to vector<1x1x8xf32>
    %cst_14 = arith.constant dense<0.000000e+00> : vector<1xf32>
    %39 = vector.multi_reduction <add>, %38, %cst_14 [1, 2] : vector<1x1x8xf32> to vector<1xf32>
    %40 = vector.shape_cast %39 : vector<1xf32> to vector<1x1x1xf32>
    %41 = vector.extract %40[0, 0, 0] : f32 from vector<1x1x1xf32>
    %42 = arith.addf %37, %41 : f32
    %c1_15 = arith.constant 1 : index
    %43 = memref.load %arg5[%c1_15] : memref<2xf32, #tpu.memory_space<smem>>
    memref.store %42, %arg5[%c1_15] : memref<2xf32, #tpu.memory_space<smem>>
    %c0_i32_16 = arith.constant 0 : i32
    %44 = arith.cmpi eq, %arg0, %c0_i32_16 : i32
    %45 = arith.extui %44 : i1 to i32
    %c0_i32_17 = arith.constant 0 : i32
    %46 = arith.cmpi ne, %45, %c0_i32_17 : i32
    scf.if %46 {
      %c0_18 = arith.constant 0 : index
      %47 = memref.load %arg5[%c0_18] : memref<2xf32, #tpu.memory_space<smem>>
      %cst_19 = arith.constant 1.250000e-01 : f32
      %48 = arith.mulf %47, %cst_19 : f32
      %c1_20 = arith.constant 1 : index
      %49 = memref.load %arg5[%c1_20] : memref<2xf32, #tpu.memory_space<smem>>
      %cst_21 = arith.constant 1.250000e-01 : f32
      %50 = arith.mulf %49, %cst_21 : f32
      %51 = arith.mulf %48, %50 : f32
      %c0_22 = arith.constant 0 : index
      %c0_23 = arith.constant 0 : index
      %52 = memref.load %arg4[%c0_22, %c0_23] : memref<1x1xf32, #tpu.memory_space<smem>>
      memref.store %51, %arg4[%c0_22, %c0_23] : memref<1x1xf32, #tpu.memory_space<smem>>
    } else {
    }
    return
  }
  func.func @transform_0(%arg0: i32) -> (i32, i32) {
    %c0_i32 = arith.constant 0 : i32
    %c0_i32_0 = arith.constant 0 : i32
    return %arg0, %c0_i32 : i32, i32
  }
  func.func @transform_1(%arg0: i32) -> (i32, i32) {
    %c0_i32 = arith.constant 0 : i32
    %c0_i32_0 = arith.constant 0 : i32
    return %arg0, %c0_i32 : i32, i32
  }
  func.func @transform_2(%arg0: i32) -> (i32, i32) {
    %c0_i32 = arith.constant 0 : i32
    %c0_i32_0 = arith.constant 0 : i32
    return %c0_i32, %arg0 : i32, i32
  }
  func.func @transform_3(%arg0: i32) -> (i32, i32) {
    %c0_i32 = arith.constant 0 : i32
    %c0_i32_0 = arith.constant 0 : i32
    %c0_i32_1 = arith.constant 0 : i32
    return %c0_i32, %c0_i32_0 : i32, i32
  }
}

</mosaic_0001>

<bundles_post_ra>
// kernel: tpu_custom_call.1
= control target key start
LH: loop header
LB: loop body
LE: loop exit
PB: predicated region body
PF: predicated region fallthrough
CT: control target
= control target key end

     0   :  { %s168_s0 = inlined_call_operand.vmem [shape: f32[8,128], index: 0, kind: input, shape index: {}]   ;;  %s169_s1 = inlined_call_operand.vmem [shape: s32[8,1], index: 1, kind: input, shape index: {}]   ;;  %s170_s2 = inlined_call_operand.vmem [shape: f32[1,8], index: 2, kind: input, shape index: {}]   ;;  %s171_s3 = inlined_call_operand.hbm [shape: f32[1,1], index: 3, kind: output, shape index: {}]  }
   0x1   :  { %v23_v0 = vld [vmem:[%s168_s0] sm:$0xff] }
   0x2   :  { %8 = vsyncpa [#allocation4], 0  ;;  %32 = vmax.xlane.f32.xlu0 %v23_v0  ;;  %v134_v1 = vmov 0   ;;  %v24_v2 = vld [vmem:[%s169_s1] sm:$0xff]  ;;  %v41_v7 = vlaneseq  ;;  %vm53_vm1 = vcmask 7168   ;;  %vm68_vm2 = vcmask 57344  }
   0x3   :  { %115 = vset.pattern.permute.xlu0 %v134_v1  ;;  %v25_v17 = vld [vmem:[%s170_s2] sm:$0x1]  ;;  %s97_s18 = sshll.u32 %s171_s3, 4  ;;  %s135_s23 = smov [#allocation3]   ;;  %s98_s18 = int_to_ptr.hbm [resolvable:$true] %s97_s18 }
   0x4   :  { %v42_v8 = vand.u32 127, %v41_v7  ;;  %v69_v18 = vsel %vm68_vm2, %v25_v17, 0.0 }
  0x16   :  { %44 = vperm.xlu0 %115, %v24_v2  }
  0x75   :  { %v33_v3 = vpop.xlane.xlu0 %32 }
  0x76   :  { %v34_v4 = vsub.f32 %v23_v0, %v33_v3 }
  0x78   :  { %v35_v5 = vmul.f32 1.442695, %v34_v4 }
  0x7a   :  { %116 = vpow2.f32 %v35_v5 }
  0x80   :  { %v117_v6 = vpop.eup %116 }
  0x81   :  { %37 = vadd.xlane.f32.xlu1 %v117_v6 }
  0x88   :  { %v45_v9 = vpop.permute.xlu0 %44 }
  0x89   :  { %vm46_vm0 = vcmp.eq.s32.totalorder %v42_v8, %v45_v9 }
  0x8a   :  { %v47_v10 = vsel %vm46_vm0, %v34_v4, 0.0 }
  0x8b   :  { %48 = vadd.xlane.f32.xlu1 %v47_v10 }
  0xf4   :  { %v38_v11 = vpop.xlane.xlu1 %37 }
  0xf5   :  { %118 = vlog2.f32 %v38_v11 }
  0xfb   :  { %v119_v12 = vpop.eup %118 }
  0xfc   :  { %v40_v13 = vmul.f32 0.6931472, %v119_v12 }
  0xfe   :  { %v49_v14 = vpop.xlane.xlu1 %48 }
  0xff   :  { %v50_v15 = vsub.f32 %v40_v13, %v49_v14 }
 0x101   :  { %v54_v16 = vsel %vm53_vm1, %v50_v15, 0.0 }
 0x102   :  { %55 = vadd.xlane.f32.xlu2 %v54_v16 }
 0x10a   :  { %70 = vadd.xlane.f32.xlu2 %v69_v18 }
 0x175   :  { %v56_v19 = vpop.xlane.xlu2 %55 }
 0x176   :  { %v57_v20 = vrot.slane %v56_v19, 4 }
 0x178   :  { %v58_v21 = vadd.f32 %v57_v20, %v56_v19 }
 0x17a   :  { %v59_v22 = vrot.slane %v58_v21, 2 }
 0x17c   :  { %v60_v23 = vadd.f32 %v59_v22, %v58_v21 }
 0x17d   :  { %v71_v24 = vpop.xlane.xlu2 %70 }
 0x17e   :  { %v72_v25 = vrot.slane %v71_v24, 4  ;;  %v61_v26 = vrot.slane %v60_v23, 1 }
 0x180   :  { %v73_v27 = vadd.f32 %v72_v25, %v71_v24  ;;  %v62_v28 = vadd.f32 %v61_v26, %v60_v23 }
 0x182   :  { %v74_v29 = vrot.slane %v73_v27, 2  ;;  %109 = vpush %v62_v28 }
 0x184   :  { %v75_v30 = vadd.f32 %v74_v29, %v73_v27 }
 0x186   :  { %v76_v31 = vrot.slane %v75_v30, 1 }
 0x188   :  { %v77_v32 = vadd.f32 %v76_v31, %v75_v30 }
 0x18a   :  { %111 = vpush %v77_v32 }
 0x1b3   :  { %s110_s2 = spop %109 }
 0x1b4   :  { %s86_s19 = smul.f32 0.125, %s110_s2 }
 0x1bb   :  { %s112_s20 = spop %111 }
 0x1bc   :  { %s88_s21 = smul.f32 0.125, %s112_s20 }
 0x1be   :  { %s89_s22 = smul.f32 %s88_s21, %s86_s19 }
 0x1c0   :  { %91 = sst [smem:[#allocation3]] %s89_s22 }
 0x1c1   :  { %100 = dma.smem_to_hbm %s135_s23, 16, %s98_s18, [#allocation4]  }
 0x1c2   :  { %132 = dma.done.wait [#allocation4], 16  }
 0x1c3   :  { %133 = vsyncadd [#allocation4], 4294967280 }
 0x1c4   :  { %105 = sfence }
 0x1c5   :  { %106 = vsyncpa [#allocation4], 1 }

</bundles_post_ra>
